<compile_context>
chip_gen: v6e
topology: v6e:2x2x1
jax: 0.10.0
libtpu: 0.0.40
codegen_flags: <defaults>
</compile_context>

<pallas_src>
import functools

import jax
import jax.numpy as jnp
from jax.experimental import pallas as pl
from jax.experimental.pallas import tpu as pltpu


def _round_up(x, m):
    return ((x + m - 1) // m) * m


def _cdiv(a, b):
    return (a + b - 1) // b


def se_block_kernel(x_ref, w1_ref, b1_ref, w2_ref, b2_ref, o_ref, acc_ref, *,
                    hw, thw, mask_tail):
    # x_ref: (Bt, C, thw) ; w1_ref: (C, hidden) ; b1_ref: (1, hidden)
    # w2_ref: (hidden, out_ch) ; b2_ref: (1, out_ch)
    # o_ref: (Bt, 1, out_ch) ; acc_ref: (Bt, C, thw) f32 scratch
    s = pl.program_id(1)

    @pl.when(s == 0)
    def _init():
        acc_ref[...] = jnp.zeros_like(acc_ref)

    xv = x_ref[...].astype(jnp.float32)                       # (Bt, C, thw)
    if mask_tail:
        # No host-side padding: the last spatial tile may extend past the true
        # H*W; those lanes hold undefined data and MUST be zeroed before the
        # accumulate. rem >= thw on every non-last tile (mask is all-true).
        rem = hw - s * thw
        lane = jax.lax.broadcasted_iota(jnp.int32, (1, 1, thw), 2)
        xv = jnp.where(lane < rem, xv, 0.0)

    # Pure element-wise VPU accumulation per tile; the single cross-lane (XLU)
    # reduction + relayout happens once, inside the finalize below.
    acc_ref[...] += xv

    @pl.when(s == pl.num_programs(1) - 1)
    def _finalize():
        # Global average pool: reduce the accumulated row once, divide by the
        # TRUE H*W (masking above keeps padding out of the sum).
        y = jnp.sum(acc_ref[...], axis=-1) * (1.0 / float(hw))      # (Bt, C)
        # fc1 + ReLU
        h = jnp.dot(y, w1_ref[...], preferred_element_type=jnp.float32) + b1_ref[...]
        h = jnp.maximum(h, 0.0)
        # fc2 + Sigmoid
        z = jnp.dot(h, w2_ref[...], preferred_element_type=jnp.float32) + b2_ref[...]
        o_ref[...] = jax.nn.sigmoid(z).astype(o_ref.dtype)[:, None, :]


def se_block(x, w1, b1, w2, b2, *, buffer_budget_bytes=None, batch_tile_cap=8):
    """x: (B, C, H, W) NCHW (f32 or bf16). Returns (B, out_ch, 1, 1)."""
    B, C, H, W = x.shape
    hidden = w1.shape[1]
    out_ch = w2.shape[1]
    hw = H * W
    itemsize = x.dtype.itemsize
    w_itemsize = w1.dtype.itemsize

    # --- generation-aware budgets -------------------------------------------
    try:
        vmem_cap = int(pltpu.get_tpu_info().vmem_capacity_bytes)
    except Exception:
        vmem_cap = 64 * 2**20  # conservative fallback: v7x per-TensorCore VMEM
    if buffer_budget_bytes is None:
        # ~8 MiB per streamed input buffer on 128 MiB chips (v5e/v6e),
        # ~4 MiB on v7x (64 MiB); never below 256 KiB.
        buffer_budget_bytes = max(256 * 1024, min(8 * 2**20, vmem_cap // 16))

    # --- batch tile: largest divisor of B (<= cap) that fits at thw = 128 ---
    bt = min(B, batch_tile_cap)
    while bt > 1 and (B % bt != 0 or bt * C * 128 * itemsize > buffer_budget_bytes):
        bt -= 1

    # --- spatial tile: as many 128-lane columns as the byte budget allows ---
    thw_cap = max(128, (buffer_budget_bytes // (bt * C * itemsize)) // 128 * 128)
    if hw <= thw_cap:
        thw, num_s, mask_tail = hw, 1, False            # whole row, one block
    else:
        thw = thw_cap                                   # multiple of 128
        num_s = _cdiv(hw, thw)
        mask_tail = (hw % thw) != 0                     # partial last tile

    # Host-side glue: flatten spatial dims only (NO padding pass over HBM).
    x3 = x.reshape(B, C, hw)
    b1_2d = b1.reshape(1, hidden)
    b2_2d = b2.reshape(1, out_ch)

    kernel = functools.partial(se_block_kernel, hw=hw, thw=thw, mask_tail=mask_tail)

    # --- VMEM accounting (with sublane/lane padding) and limit ---------------
    def _pad(v, m):
        return _round_up(max(int(v), 1), m)

    est_vmem = (
        2 * bt * _pad(C, 8) * _pad(thw, 128) * itemsize        # streamed input, double-buffered
        + bt * _pad(C, 8) * _pad(thw, 128) * 4                 # f32 accumulator scratch
        + 2 * (_pad(C, 8) * _pad(hidden, 128)                  # weights (worst case: 2 bufs)
               + _pad(hidden, 8) * _pad(out_ch, 128)
               + 8 * _pad(hidden, 128) + 8 * _pad(out_ch, 128)) * w_itemsize
        + 2 * bt * 8 * _pad(out_ch, 128) * itemsize            # output block
    )
    vmem_limit = int(min(int(0.75 * vmem_cap), max(8 * 2**20, int(1.5 * est_vmem))))

    cost = pl.CostEstimate(
        flops=B * C * hw + 2 * B * C * hidden + 2 * B * hidden * out_ch,
        transcendentals=B * out_ch,
        bytes_accessed=(
            B * C * hw * itemsize
            + (w1.size + w2.size + b1.size + b2.size) * w_itemsize
            + B * out_ch * itemsize
        ),
    )

    def _call(single_buffer_weights):
        if single_buffer_weights:
            def resident(shape):
                return pl.BlockSpec(shape, lambda b, s: (0, 0),
                                    pipeline_mode=pl.Buffered(1))
        else:
            def resident(shape):
                return pl.BlockSpec(shape, lambda b, s: (0, 0))
        return pl.pallas_call(
            kernel,
            out_shape=jax.ShapeDtypeStruct((B, 1, out_ch), x.dtype),
            grid_spec=pltpu.PrefetchScalarGridSpec(
                num_scalar_prefetch=0,
                grid=(B // bt, num_s),
                in_specs=[
                    pl.BlockSpec((bt, C, thw), lambda b, s: (b, 0, s)),  # streamed input
                    resident((C, hidden)),                               # resident weights
                    resident((1, hidden)),
                    resident((hidden, out_ch)),
                    resident((1, out_ch)),
                ],
                out_specs=pl.BlockSpec((bt, 1, out_ch), lambda b, s: (b, 0, 0)),
                scratch_shapes=[pltpu.VMEM((bt, C, thw), jnp.float32)],
            ),
            compiler_params=pltpu.CompilerParams(
                dimension_semantics=("parallel", "arbitrary"),
                vmem_limit_bytes=vmem_limit,
            ),
            cost_estimate=cost,
        )(x3, w1, b1_2d, w2, b2_2d)

    # TODO(synk): when B == 1 on v7x, split the spatial reduction across both
    # TensorCores (per-core partial sums + tiny combine pass) so neither idles.
    try:
        out = _call(single_buffer_weights=True)    # resident weights, 1 buffer each
    except Exception:
        out = _call(single_buffer_weights=False)   # fallback: older Pallas w/o pipeline_mode
    return out.reshape(B, out_ch, 1, 1)


def init_se_params(key, in_ch, out_ch, r=1):
    """Deterministic init mimicking PyTorch nn.Linear defaults
    (uniform(-1/sqrt(fan_in), 1/sqrt(fan_in))). Weights stored as (in, out)."""
    hidden = int(in_ch * r)
    k1, k2, k3, k4 = jax.random.split(key, 4)
    lim1 = 1.0 / jnp.sqrt(jnp.float32(in_ch))
    lim2 = 1.0 / jnp.sqrt(jnp.float32(hidden))
    w1 = jax.random.uniform(k1, (in_ch, hidden), jnp.float32, -lim1, lim1)
    b1 = jax.random.uniform(k2, (hidden,), jnp.float32, -lim1, lim1)
    w2 = jax.random.uniform(k3, (hidden, out_ch), jnp.float32, -lim2, lim2)
    b2 = jax.random.uniform(k4, (out_ch,), jnp.float32, -lim2, lim2)
    return w1, b1, w2, b2


def se_block_reference(x, w1, b1, w2, b2):
    """Pure-JAX reference of the PyTorch forward."""
    B, C, _, _ = x.shape
    y = jnp.mean(x, axis=(2, 3))                     # (B, C)
    h = jnp.maximum(y @ w1 + b1, 0.0)
    z = jax.nn.sigmoid(h @ w2 + b2)
    return z.reshape(B, -1, 1, 1)


if __name__ == "__main__":
    key = jax.random.PRNGKey(0)
    kx, kp = jax.random.split(key)

    # 1) Small canonical shape.
    B, C, H, W = 2, 4, 16, 16
    out_ch, r = 4, 1
    x = jax.random.normal(kx, (B, C, H, W), dtype=jnp.float32)
    w1, b1, w2, b2 = init_se_params(kp, C, out_ch, r)
    out = jax.block_until_ready(se_block(x, w1, b1, w2, b2))
    ref = se_block_reference(x, w1, b1, w2, b2)
    assert out.shape == (B, out_ch, 1, 1), out.shape
    assert jnp.allclose(out, ref, atol=1e-5, rtol=1e-5), "mismatch vs reference"

    # 2) Non-128-aligned spatial extent (56*56 = 3136), forced through the
    #    tiled + masked-tail path with a tiny buffer budget (no host padding).
    x2 = jax.random.normal(kx, (2, 8, 56, 56), dtype=jnp.float32)
    w1b, b1b, w2b, b2b = init_se_params(kp, 8, 8, 1)
    out2 = jax.block_until_ready(
        se_block(x2, w1b, b1b, w2b, b2b, buffer_budget_bytes=32 * 1024))
    ref2 = se_block_reference(x2, w1b, b1b, w2b, b2b)
    assert jnp.allclose(out2, ref2, atol=1e-5, rtol=1e-5), "mismatch (tiled/masked)"

    # 3) Same shape with default byte-budget tiling and bf16 activation stream.
    x3 = x2.astype(jnp.bfloat16)
    out3 = jax.block_until_ready(se_block(x3, w1b, b1b, w2b, b2b))
    ref3 = se_block_reference(x3.astype(jnp.float32), w1b, b1b, w2b, b2b)
    assert jnp.allclose(out3.astype(jnp.float32), ref3, atol=2e-2, rtol=2e-2), "mismatch (bf16)"

    print("KERNEL_OK")
</pallas_src>

<mosaic_0001>
module attributes {stable_mosaic.version = 11 : i64} {
  func.func @se_block_kernel(%arg0: i32, %arg1: i32, %arg2: memref<2x4x256xf32, #tpu.memory_space<vmem>>, %arg3: memref<4x4xf32, #tpu.memory_space<vmem>>, %arg4: memref<1x4xf32, #tpu.memory_space<vmem>>, %arg5: memref<4x4xf32, #tpu.memory_space<vmem>>, %arg6: memref<1x4xf32, #tpu.memory_space<vmem>>, %arg7: memref<2x1x4xf32, #tpu.memory_space<vmem>>, %arg8: memref<2x4x256xf32, #tpu.memory_space<vmem>>) attributes {dimension_semantics = [#tpu.dimension_semantics<parallel>, #tpu.dimension_semantics<arbitrary>], iteration_bounds = array<i64: 1, 1>, scalar_prefetch = 0 : i64, scratch_operands = 1 : i64, tpu.core_type = #tpu.core_type<tc>, window_params = [{transform_indices = @transform_0, window_bounds = array<i64: 2, 4, 256>}, {pipeline_mode = #tpu.pipeline_mode<synchronous>, transform_indices = @transform_1, window_bounds = array<i64: 4, 4>}, {pipeline_mode = #tpu.pipeline_mode<synchronous>, transform_indices = @transform_2, window_bounds = array<i64: 1, 4>}, {pipeline_mode = #tpu.pipeline_mode<synchronous>, transform_indices = @transform_3, window_bounds = array<i64: 4, 4>}, {pipeline_mode = #tpu.pipeline_mode<synchronous>, transform_indices = @transform_4, window_bounds = array<i64: 1, 4>}, {transform_indices = @transform_5, window_bounds = array<i64: 2, 1, 4>}]} {
    %c0_i32 = arith.constant 0 : i32
    %0 = arith.cmpi eq, %arg1, %c0_i32 : i32
    %1 = arith.extui %0 : i1 to i32
    %c0_i32_0 = arith.constant 0 : i32
    %2 = arith.cmpi ne, %1, %c0_i32_0 : i32
    scf.if %2 {
      %cst = arith.constant 0.000000e+00 : f32
      %10 = vector.broadcast %cst : f32 to vector<2x4x256xf32>
      %c0_11 = arith.constant 0 : index
      %c0_12 = arith.constant 0 : index
      %c0_13 = arith.constant 0 : index
      %11 = vector.load %arg8[%c0_11, %c0_12, %c0_13] : memref<2x4x256xf32, #tpu.memory_space<vmem>>, vector<2x4x256xf32>
      tpu.vector_store %arg8[%c0_11, %c0_12, %c0_13], %10 {strides = array<i32>} : memref<2x4x256xf32, #tpu.memory_space<vmem>>, vector<2x4x256xf32>,
    } else {
    }
    %c0 = arith.constant 0 : index
    %c0_1 = arith.constant 0 : index
    %c0_2 = arith.constant 0 : index
    %3 = vector.load %arg2[%c0, %c0_1, %c0_2] : memref<2x4x256xf32, #tpu.memory_space<vmem>>, vector<2x4x256xf32>
    %c0_3 = arith.constant 0 : index
    %c0_4 = arith.constant 0 : index
    %c0_5 = arith.constant 0 : index
    %4 = vector.load %arg8[%c0_3, %c0_4, %c0_5] : memref<2x4x256xf32, #tpu.memory_space<vmem>>, vector<2x4x256xf32>
    %5 = arith.addf %4, %3 : vector<2x4x256xf32>
    %c0_6 = arith.constant 0 : index
    %c0_7 = arith.constant 0 : index
    %c0_8 = arith.constant 0 : index
    %6 = vector.load %arg8[%c0_6, %c0_7, %c0_8] : memref<2x4x256xf32, #tpu.memory_space<vmem>>, vector<2x4x256xf32>
    tpu.vector_store %arg8[%c0_6, %c0_7, %c0_8], %5 {strides = array<i32>} : memref<2x4x256xf32, #tpu.memory_space<vmem>>, vector<2x4x256xf32>,
    %c0_i32_9 = arith.constant 0 : i32
    %7 = arith.cmpi eq, %arg1, %c0_i32_9 : i32
    %8 = arith.extui %7 : i1 to i32
    %c0_i32_10 = arith.constant 0 : i32
    %9 = arith.cmpi ne, %8, %c0_i32_10 : i32
    scf.if %9 {
      %c0_11 = arith.constant 0 : index
      %c0_12 = arith.constant 0 : index
      %c0_13 = arith.constant 0 : index
      %10 = vector.load %arg8[%c0_11, %c0_12, %c0_13] : memref<2x4x256xf32, #tpu.memory_space<vmem>>, vector<2x4x256xf32>
      %cst = arith.constant dense<0.000000e+00> : vector<2x4xf32>
      %11 = vector.multi_reduction <add>, %10, %cst [2] : vector<2x4x256xf32> to vector<2x4xf32>
      %cst_14 = arith.constant 3.906250e-03 : f32
      %12 = vector.broadcast %cst_14 : f32 to vector<2x4xf32>
      %13 = arith.mulf %11, %12 : vector<2x4xf32>
      %c0_15 = arith.constant 0 : index
      %c0_16 = arith.constant 0 : index
      %14 = vector.load %arg3[%c0_15, %c0_16] : memref<4x4xf32, #tpu.memory_space<vmem>>, vector<4x4xf32>
      %cst_17 = arith.constant dense<0.000000e+00> : vector<2x4xf32>
      %15 = tpu.matmul %13, %14, %cst_17 {dimension_numbers = #tpu.dot_dimension_numbers<[1], [0], [0], [1], [0, 0, 1, 1], [], []>} : vector<2x4xf32>, vector<4x4xf32>, vector<2x4xf32> -> vector<2x4xf32>
      %c0_18 = arith.constant 0 : index
      %c0_19 = arith.constant 0 : index
      %16 = vector.load %arg4[%c0_18, %c0_19] : memref<1x4xf32, #tpu.memory_space<vmem>>, vector<1x4xf32>
      %17 = vector.broadcast %16 : vector<1x4xf32> to vector<2x4xf32>
      %18 = arith.addf %15, %17 : vector<2x4xf32>
      %cst_20 = arith.constant 0.000000e+00 : f32
      %19 = vector.broadcast %cst_20 : f32 to vector<2x4xf32>
      %20 = arith.maximumf %18, %19 : vector<2x4xf32>
      %c0_21 = arith.constant 0 : index
      %c0_22 = arith.constant 0 : index
      %21 = vector.load %arg5[%c0_21, %c0_22] : memref<4x4xf32, #tpu.memory_space<vmem>>, vector<4x4xf32>
      %cst_23 = arith.constant dense<0.000000e+00> : vector<2x4xf32>
      %22 = tpu.matmul %20, %21, %cst_23 {dimension_numbers = #tpu.dot_dimension_numbers<[1], [0], [0], [1], [0, 0, 1, 1], [], []>} : vector<2x4xf32>, vector<4x4xf32>, vector<2x4xf32> -> vector<2x4xf32>
      %c0_24 = arith.constant 0 : index
      %c0_25 = arith.constant 0 : index
      %23 = vector.load %arg6[%c0_24, %c0_25] : memref<1x4xf32, #tpu.memory_space<vmem>>, vector<1x4xf32>
      %24 = vector.broadcast %23 : vector<1x4xf32> to vector<2x4xf32>
      %25 = arith.addf %22, %24 : vector<2x4xf32>
      %26 = arith.negf %25 : vector<2x4xf32>
      %27 = math.exp %26 : vector<2x4xf32>
      %cst_26 = arith.constant 1.000000e+00 : f32
      %28 = vector.broadcast %cst_26 : f32 to vector<2x4xf32>
      %29 = arith.addf %28, %27 : vector<2x4xf32>
      %30 = arith.divf %28, %29 : vector<2x4xf32>
      %31 = vector.shape_cast %30 : vector<2x4xf32> to vector<2x1x4xf32>
      %c0_27 = arith.constant 0 : index
      %c0_28 = arith.constant 0 : index
      %c0_29 = arith.constant 0 : index
      %32 = vector.load %arg7[%c0_27, %c0_28, %c0_29] : memref<2x1x4xf32, #tpu.memory_space<vmem>>, vector<2x1x4xf32>
      tpu.vector_store %arg7[%c0_27, %c0_28, %c0_29], %31 {strides = array<i32>} : memref<2x1x4xf32, #tpu.memory_space<vmem>>, vector<2x1x4xf32>,
    } else {
    }
    return
  }
  func.func @transform_0(%arg0: i32, %arg1: i32) -> (i32, i32, i32) {
    %c0_i32 = arith.constant 0 : i32
    %c0_i32_0 = arith.constant 0 : i32
    return %arg0, %c0_i32, %arg1 : i32, i32, i32
  }
  func.func @transform_1(%arg0: i32, %arg1: i32) -> (i32, i32) {
    %c0_i32 = arith.constant 0 : i32
    %c0_i32_0 = arith.constant 0 : i32
    %c0_i32_1 = arith.constant 0 : i32
    return %c0_i32, %c0_i32_0 : i32, i32
  }
  func.func @transform_2(%arg0: i32, %arg1: i32) -> (i32, i32) {
    %c0_i32 = arith.constant 0 : i32
    %c0_i32_0 = arith.constant 0 : i32
    %c0_i32_1 = arith.constant 0 : i32
    return %c0_i32, %c0_i32_0 : i32, i32
  }
  func.func @transform_3(%arg0: i32, %arg1: i32) -> (i32, i32) {
    %c0_i32 = arith.constant 0 : i32
    %c0_i32_0 = arith.constant 0 : i32
    %c0_i32_1 = arith.constant 0 : i32
    return %c0_i32, %c0_i32_0 : i32, i32
  }
  func.func @transform_4(%arg0: i32, %arg1: i32) -> (i32, i32) {
    %c0_i32 = arith.constant 0 : i32
    %c0_i32_0 = arith.constant 0 : i32
    %c0_i32_1 = arith.constant 0 : i32
    return %c0_i32, %c0_i32_0 : i32, i32
  }
  func.func @transform_5(%arg0: i32, %arg1: i32) -> (i32, i32, i32) {
    %c0_i32 = arith.constant 0 : i32
    %c0_i32_0 = arith.constant 0 : i32
    %c0_i32_1 = arith.constant 0 : i32
    return %arg0, %c0_i32, %c0_i32_0 : i32, i32, i32
  }
}

module attributes {stable_mosaic.version = 11 : i64} {
  func.func @se_block_kernel(%arg0: i32, %arg1: i32, %arg2: memref<2x4x256xf32, #tpu.memory_space<vmem>>, %arg3: memref<4x4xf32, #tpu.memory_space<vmem>>, %arg4: memref<1x4xf32, #tpu.memory_space<vmem>>, %arg5: memref<4x4xf32, #tpu.memory_space<vmem>>, %arg6: memref<1x4xf32, #tpu.memory_space<vmem>>, %arg7: memref<2x1x4xf32, #tpu.memory_space<vmem>>, %arg8: memref<2x4x256xf32, #tpu.memory_space<vmem>>) attributes {dimension_semantics = [#tpu.dimension_semantics<parallel>, #tpu.dimension_semantics<arbitrary>], iteration_bounds = array<i64: 1, 1>, scalar_prefetch = 0 : i64, scratch_operands = 1 : i64, tpu.core_type = #tpu.core_type<tc>, window_params = [{transform_indices = @transform_0, window_bounds = array<i64: 2, 4, 256>}, {pipeline_mode = #tpu.pipeline_mode<synchronous>, transform_indices = @transform_1, window_bounds = array<i64: 4, 4>}, {pipeline_mode = #tpu.pipeline_mode<synchronous>, transform_indices = @transform_2, window_bounds = array<i64: 1, 4>}, {pipeline_mode = #tpu.pipeline_mode<synchronous>, transform_indices = @transform_3, window_bounds = array<i64: 4, 4>}, {pipeline_mode = #tpu.pipeline_mode<synchronous>, transform_indices = @transform_4, window_bounds = array<i64: 1, 4>}, {transform_indices = @transform_5, window_bounds = array<i64: 2, 1, 4>}]} {
    %c0_i32 = arith.constant 0 : i32
    %0 = arith.cmpi eq, %arg1, %c0_i32 : i32
    %1 = arith.extui %0 : i1 to i32
    %c0_i32_0 = arith.constant 0 : i32
    %2 = arith.cmpi ne, %1, %c0_i32_0 : i32
    scf.if %2 {
      %cst = arith.constant 0.000000e+00 : f32
      %10 = vector.broadcast %cst : f32 to vector<2x4x256xf32>
      %c0_11 = arith.constant 0 : index
      %c0_12 = arith.constant 0 : index
      %c0_13 = arith.constant 0 : index
      %11 = vector.load %arg8[%c0_11, %c0_12, %c0_13] : memref<2x4x256xf32, #tpu.memory_space<vmem>>, vector<2x4x256xf32>
      tpu.vector_store %arg8[%c0_11, %c0_12, %c0_13], %10 {strides = array<i32>} : memref<2x4x256xf32, #tpu.memory_space<vmem>>, vector<2x4x256xf32>,
    } else {
    }
    %c0 = arith.constant 0 : index
    %c0_1 = arith.constant 0 : index
    %c0_2 = arith.constant 0 : index
    %3 = vector.load %arg2[%c0, %c0_1, %c0_2] : memref<2x4x256xf32, #tpu.memory_space<vmem>>, vector<2x4x256xf32>
    %c0_3 = arith.constant 0 : index
    %c0_4 = arith.constant 0 : index
    %c0_5 = arith.constant 0 : index
    %4 = vector.load %arg8[%c0_3, %c0_4, %c0_5] : memref<2x4x256xf32, #tpu.memory_space<vmem>>, vector<2x4x256xf32>
    %5 = arith.addf %4, %3 : vector<2x4x256xf32>
    %c0_6 = arith.constant 0 : index
    %c0_7 = arith.constant 0 : index
    %c0_8 = arith.constant 0 : index
    %6 = vector.load %arg8[%c0_6, %c0_7, %c0_8] : memref<2x4x256xf32, #tpu.memory_space<vmem>>, vector<2x4x256xf32>
    tpu.vector_store %arg8[%c0_6, %c0_7, %c0_8], %5 {strides = array<i32>} : memref<2x4x256xf32, #tpu.memory_space<vmem>>, vector<2x4x256xf32>,
    %c0_i32_9 = arith.constant 0 : i32
    %7 = arith.cmpi eq, %arg1, %c0_i32_9 : i32
    %8 = arith.extui %7 : i1 to i32
    %c0_i32_10 = arith.constant 0 : i32
    %9 = arith.cmpi ne, %8, %c0_i32_10 : i32
    scf.if %9 {
      %c0_11 = arith.constant 0 : index
      %c0_12 = arith.constant 0 : index
      %c0_13 = arith.constant 0 : index
      %10 = vector.load %arg8[%c0_11, %c0_12, %c0_13] : memref<2x4x256xf32, #tpu.memory_space<vmem>>, vector<2x4x256xf32>
      %cst = arith.constant dense<0.000000e+00> : vector<2x4xf32>
      %11 = vector.multi_reduction <add>, %10, %cst [2] : vector<2x4x256xf32> to vector<2x4xf32>
      %cst_14 = arith.constant 3.906250e-03 : f32
      %12 = vector.broadcast %cst_14 : f32 to vector<2x4xf32>
      %13 = arith.mulf %11, %12 : vector<2x4xf32>
      %c0_15 = arith.constant 0 : index
      %c0_16 = arith.constant 0 : index
      %14 = vector.load %arg3[%c0_15, %c0_16] : memref<4x4xf32, #tpu.memory_space<vmem>>, vector<4x4xf32>
      %cst_17 = arith.constant dense<0.000000e+00> : vector<2x4xf32>
      %15 = tpu.matmul %13, %14, %cst_17 {dimension_numbers = #tpu.dot_dimension_numbers<[1], [0], [0], [1], [0, 0, 1, 1], [], []>} : vector<2x4xf32>, vector<4x4xf32>, vector<2x4xf32> -> vector<2x4xf32>
      %c0_18 = arith.constant 0 : index
      %c0_19 = arith.constant 0 : index
      %16 = vector.load %arg4[%c0_18, %c0_19] : memref<1x4xf32, #tpu.memory_space<vmem>>, vector<1x4xf32>
      %17 = vector.broadcast %16 : vector<1x4xf32> to vector<2x4xf32>
      %18 = arith.addf %15, %17 : vector<2x4xf32>
      %cst_20 = arith.constant 0.000000e+00 : f32
      %19 = vector.broadcast %cst_20 : f32 to vector<2x4xf32>
      %20 = arith.maximumf %18, %19 : vector<2x4xf32>
      %c0_21 = arith.constant 0 : index
      %c0_22 = arith.constant 0 : index
      %21 = vector.load %arg5[%c0_21, %c0_22] : memref<4x4xf32, #tpu.memory_space<vmem>>, vector<4x4xf32>
      %cst_23 = arith.constant dense<0.000000e+00> : vector<2x4xf32>
      %22 = tpu.matmul %20, %21, %cst_23 {dimension_numbers = #tpu.dot_dimension_numbers<[1], [0], [0], [1], [0, 0, 1, 1], [], []>} : vector<2x4xf32>, vector<4x4xf32>, vector<2x4xf32> -> vector<2x4xf32>
      %c0_24 = arith.constant 0 : index
      %c0_25 = arith.constant 0 : index
      %23 = vector.load %arg6[%c0_24, %c0_25] : memref<1x4xf32, #tpu.memory_space<vmem>>, vector<1x4xf32>
      %24 = vector.broadcast %23 : vector<1x4xf32> to vector<2x4xf32>
      %25 = arith.addf %22, %24 : vector<2x4xf32>
      %26 = arith.negf %25 : vector<2x4xf32>
      %27 = math.exp %26 : vector<2x4xf32>
      %cst_26 = arith.constant 1.000000e+00 : f32
      %28 = vector.broadcast %cst_26 : f32 to vector<2x4xf32>
      %29 = arith.addf %28, %27 : vector<2x4xf32>
      %30 = arith.divf %28, %29 : vector<2x4xf32>
      %31 = vector.shape_cast %30 : vector<2x4xf32> to vector<2x1x4xf32>
      %c0_27 = arith.constant 0 : index
      %c0_28 = arith.constant 0 : index
      %c0_29 = arith.constant 0 : index
      %32 = vector.load %arg7[%c0_27, %c0_28, %c0_29] : memref<2x1x4xf32, #tpu.memory_space<vmem>>, vector<2x1x4xf32>
      tpu.vector_store %arg7[%c0_27, %c0_28, %c0_29], %31 {strides = array<i32>} : memref<2x1x4xf32, #tpu.memory_space<vmem>>, vector<2x1x4xf32>,
    } else {
    }
    return
  }
  func.func @transform_0(%arg0: i32, %arg1: i32) -> (i32, i32, i32) {
    %c0_i32 = arith.constant 0 : i32
    %c0_i32_0 = arith.constant 0 : i32
    return %arg0, %c0_i32, %arg1 : i32, i32, i32
  }
  func.func @transform_1(%arg0: i32, %arg1: i32) -> (i32, i32) {
    %c0_i32 = arith.constant 0 : i32
    %c0_i32_0 = arith.constant 0 : i32
    %c0_i32_1 = arith.constant 0 : i32
    return %c0_i32, %c0_i32_0 : i32, i32
  }
  func.func @transform_2(%arg0: i32, %arg1: i32) -> (i32, i32) {
    %c0_i32 = arith.constant 0 : i32
    %c0_i32_0 = arith.constant 0 : i32
    %c0_i32_1 = arith.constant 0 : i32
    return %c0_i32, %c0_i32_0 : i32, i32
  }
  func.func @transform_3(%arg0: i32, %arg1: i32) -> (i32, i32) {
    %c0_i32 = arith.constant 0 : i32
    %c0_i32_0 = arith.constant 0 : i32
    %c0_i32_1 = arith.constant 0 : i32
    return %c0_i32, %c0_i32_0 : i32, i32
  }
  func.func @transform_4(%arg0: i32, %arg1: i32) -> (i32, i32) {
    %c0_i32 = arith.constant 0 : i32
    %c0_i32_0 = arith.constant 0 : i32
    %c0_i32_1 = arith.constant 0 : i32
    return %c0_i32, %c0_i32_0 : i32, i32
  }
  func.func @transform_5(%arg0: i32, %arg1: i32) -> (i32, i32, i32) {
    %c0_i32 = arith.constant 0 : i32
    %c0_i32_0 = arith.constant 0 : i32
    %c0_i32_1 = arith.constant 0 : i32
    return %arg0, %c0_i32, %c0_i32_0 : i32, i32, i32
  }
}

</mosaic_0001>

<bundles_post_ra>
// kernel: tpu_custom_call.1
= control target key start
LH: loop header
LB: loop body
LE: loop exit
PB: predicated region body
PF: predicated region fallthrough
CT: control target
= control target key end

     0   :  { %10 = vsyncpa [#allocation4], 0  ;;  %s487_s0 = inlined_call_operand.hbm [shape: f32[2,4,256], index: 0, kind: input, shape index: {}]   ;;  %s488_s1 = inlined_call_operand.hbm [shape: f32[4,4], index: 1, kind: input, shape index: {}]   ;;  %s489_s2 = inlined_call_operand.vmem [shape: f32[1,4], index: 2, kind: input, shape index: {}]   ;;  %s490_s3 = inlined_call_operand.vmem [shape: f32[4,4], index: 3, kind: input, shape index: {}]   ;;  %s491_s4 = inlined_call_operand.vmem [shape: f32[1,4], index: 4, kind: input, shape index: {}]   ;;  %s492_s5 = inlined_call_operand.hbm [shape: f32[2,1,4], index: 5, kind: output, shape index: {}]  }
   0x1   :  { %11 = vsyncpa [#allocation7], 0 }
   0x2   :  { %12 = vsyncpa [#allocation5], 0  ;;  %s423_s18 = smov [#allocation3]  }
   0x3   :  { %s18_s19 = sshll.u32 %s423_s18, 4  ;;  %s19_s19 = int_to_ptr.vmem [resolvable:$true] %s18_s19 }
   0x4   :  { %s365_s20 = scalar_lea.vmem %s19_s19, 256  ;;  %p370_p1 = scmp.lt.s32.totalorder %s19_s19, %s19_s19 }
   0x5   :  { %p366_p0 = scmp.ne.s32.totalorder %s19_s19, %s365_s20  ;;  %p371_p2 = scmp.lt.s32.totalorder %s365_s20, %s365_s20 }
   0x7   :  { %p372_p3 = por %p371_p2, %p370_p1 }
   0x9   :  { %p373_p4 = pnand %p372_p3, %p366_p0 }
   0xb   :  { %376 = shalt.err (!%p373_p4)
}
   0xc   :  { %s424_s21 = smov 128   ;;  %s425_s22 = smov 8  }
   0xd   :  { %24 = dma.hbm_to_vmem [thread:$0]  %s487_s0, 256, %s19_s19, [#allocation4], %s424_s21, %s424_s21, %s425_s22  }
   0xe   :  { %s426_s25 = smov [#allocation6]  }
   0xf   :  { %s31_s26 = sshll.u32 %s426_s25, 4  ;;  %s32_s26 = int_to_ptr.vmem [resolvable:$true] %s31_s26 }
  0x10   :  { %s385_s27 = scalar_lea.vmem %s32_s26, 64  ;;  %p390_p6 = scmp.lt.s32.totalorder %s32_s26, %s32_s26 }
  0x11   :  { %p386_p5 = scmp.ne.s32.totalorder %s32_s26, %s385_s27  ;;  %p391_p7 = scmp.lt.s32.totalorder %s385_s27, %s385_s27 }
  0x13   :  { %p392_p8 = por %p391_p7, %p390_p6 }
  0x15   :  { %p393_p9 = pnand %p392_p8, %p386_p5 }
  0x17   :  { %396 = shalt.err (!%p393_p9)
}
  0x18   :  { %34 = dma.hbm_to_vmem [thread:$0]  %s488_s1, 64, %s32_s26, [#allocation7]  }
  0x19   :  { %417 = dma.done.wait [#allocation4], 256  }
  0x1a   :  { %418 = vsyncadd [#allocation4], 4294967040 }
  0x1b   :  { %419 = dma.done.wait [#allocation7], 64  }
  0x1c   :  { %420 = vsyncadd [#allocation7], 4294967232  ;;  %vm72_vm0 = vcmask 1043456   ;;  %v53_v0 = vld [vmem:[#allocation3] sm:$0xff]  ;;  %v54_v1 = vld [vmem:[#allocation3 + $0x8] sm:$0xff]  ;;  %v427_v11 = vmov 0.0   ;;  %v95_v12 = vlaneseq }
  0x1d   :  { %v68_v2 = vcombine.high %v53_v0, %v53_v0  ;;  %v73_v3 = vsel %vm72_vm0, %v53_v0, 0.0  ;;  %v69_v4 = vcombine.high %v54_v1, %v54_v1  ;;  %v78_v6 = vsel %vm72_vm0, %v54_v1, 0.0  ;;  %v85_v10 = vld [vmem:[#allocation6] sm:$0xf]  ;;  %331 = vmatprep.subr.mxu0 %v427_v11  ;;  %336 = vmatprep.subr.mxu1 %v427_v11  ;;  %v184_v23 = vld [vmem:[%s490_s3] sm:$0xf] }
  0x1e   :  { %vm428_vm1 = vmmov 0   ;;  %332 = vmatpush3.msk.msra.mxu0 %vm72_vm0, %v85_v10  ;;  %v96_v13 = vand.u32 127, %v95_v12  ;;  %v98_v14 = vshrl.u32 %v95_v12, 7  ;;  %vm105_vm2 = vcmask 1041409   ;;  %337 = vmatpush3.msk.msra.mxu1 %vm72_vm0, %v184_v23  ;;  %v320_v24 = vld [vmem:[%s489_s2] ss:$0 sm:$0xff] }
  0x1f   :  { %v74_v5 = vsel %vm72_vm0, %v68_v2, 0.0  ;;  %v79_v7 = vsel %vm72_vm0, %v69_v4, 0.0  ;;  %333 = vmatprep.mubr.msk.f32.mxu0 %vm428_vm1, %v427_v11  ;;  %338 = vmatprep.mubr.msk.f32.mxu1 %vm428_vm1, %v427_v11  ;;  %vm107_vm3 = vcmask 31744   ;;  %v323_v29 = vld [vmem:[%s491_s4] ss:$0 sm:$0xff]  ;;  %s430_s2 = smov [#allocation8]  }
  0x20   :  { %v75_v8 = vadd.f32 %v74_v5, %v73_v3  ;;  %v80_v9 = vadd.f32 %v79_v7, %v78_v6  ;;  %v99_v16 = vsub.s32 %v96_v13, %v98_v14  ;;  %v429_v36 = vmov 1966171168   ;;  %s307_s3 = sshll.u32 %s430_s2, 4  ;;  %s308_s3 = int_to_ptr.vmem [resolvable:$true] %s307_s3 }
  0x21   :  { %v276_v37 = vunpack.c.l.s4 %v429_v36  ;;  %vm299_vm4 = vcmask 24576   ;;  %s397_s4 = scalar_lea.vmem %s308_s3, 32  ;;  %p402_p11 = scmp.lt.s32.totalorder %s308_s3, %s308_s3 }
  0x22   :  { %76 = vadd.xlane.f32.xlu0 %v75_v8  ;;  %p398_p10 = scmp.ne.s32.totalorder %s308_s3, %s397_s4  ;;  %p403_p12 = scmp.lt.s32.totalorder %s397_s4, %s397_s4 }
  0x23   :  { %v277_v38 = vunpack.c.0.s8 %v276_v37 }
  0x24   :  { %p404_p13 = por %p403_p12, %p402_p11 }
  0x25   :  { %v280_v39 = vsub.s32 %v277_v38, %v98_v14 }
  0x26   :  { %81 = vadd.xlane.f32.xlu0 %v80_v9  ;;  %p405_p0 = pnand %p404_p13, %p398_p10 }
  0xab   :  { %v77_v15 = vpop.xlane.xlu0 %76 }
  0xac   :  { %v83_v17 = vmul.f32 0.00390625, %v77_v15 }
  0xae   :  { %v100_v20 = vrot.slane %v83_v17, %v99_v16 }
  0xaf   :  { %v82_v18 = vpop.xlane.xlu0 %81 }
  0xb0   :  { %v84_v19 = vmul.f32 0.00390625, %v82_v18 }
  0xb2   :  { %v104_v21 = vrot.slane %v84_v19, %v99_v16 }
  0xb4   :  { %v106_v22 = vsel %vm105_vm2, %v104_v21, %v100_v20 }
  0xb5   :  { %334 = vmatmul.mubr.msk.f32.vlgmr.msra.gmra.mxu0 %vm107_vm3, %v106_v22 }
 0x175   :  { %v179_v25 = vpop.f32.mrf.mxu0 }
 0x176   :  { %v180_v26 = vadd.f32 %v320_v24, %v179_v25 }
 0x177   :  { %v335_v27 = vpop.f32.mrf.mxu0 }
 0x178   :  { %v183_v28 = vmax.f32 %v180_v26, 0.0 }
 0x17a   :  { %339 = vmatmul.mubr.msk.f32.vlgmr.msra.gmra.mxu1 %vm107_vm3, %v183_v28 }
 0x23a   :  { %v264_v30 = vpop.f32.mrf.mxu1 }
 0x23b   :  { %v265_v31 = vadd.f32 %v323_v29, %v264_v30 }
 0x23c   :  { %v340_v32 = vpop.f32.mrf.mxu1 }
 0x23d   :  { %v326_v33 = vmul.f32 -1.442695, %v265_v31 }
 0x23f   :  { %353 = vpow2.f32 %v326_v33 }
 0x24c   :  { %v354_v34 = vpop.eup %353 }
 0x24d   :  { %v271_v35 = vadd.f32 1.0, %v354_v34 }
 0x24f   :  { %355 = vrcp.f32 %v271_v35 }
 0x25c   :  { %v356_v40 = vpop.eup %355 }
 0x25d   :  { %v281_v41 = vrot.slane %v356_v40, %v280_v39 }
 0x25f   :  { %v282_v42 = vcombine.high %v281_v41, %v281_v41  ;;  %v289_v43 = vrot.slane %v281_v41, %v280_v39 }
 0x261   :  { %v296_v44 = vrot.slane %v282_v42, %v280_v39  ;;  %300 = vst.msk [vmem:[#allocation8] sm:$0x1] %vm299_vm4, %v289_v43 }
 0x263   :  { %301 = vst.msk [vmem:[#allocation8 + $0x1] sm:$0x1] %vm299_vm4, %v296_v44 }
 0x264   :  { %408 = shalt.err (!%p405_p0)
}
 0x265   :  { %s431_s9 = smov 16   ;;  %s432_s10 = smov 1  }
 0x266   :  { %313 = dma.vmem_to_hbm [thread:$0]  %s308_s3, 32, %s492_s5, [#allocation5], %s431_s9, %s431_s9, %s432_s10  }
 0x267   :  { %421 = dma.done.wait [#allocation5], 32  }
 0x268   :  { %422 = vsyncadd [#allocation5], 4294967264 }
 0x269   :  { %317 = vsyncpa [#allocation4], 1 }
 0x26a   :  { %318 = vsyncpa [#allocation7], 1 }
 0x26b   :  { %319 = vsyncpa [#allocation5], 1 }

// kernel: tpu_custom_call.1
= control target key start
LH: loop header
LB: loop body
LE: loop exit
PB: predicated region body
PF: predicated region fallthrough
CT: control target
= control target key end

     0   :  { %10 = vsyncpa [#allocation4], 0  ;;  %s487_s0 = inlined_call_operand.hbm [shape: f32[2,4,256], index: 0, kind: input, shape index: {}]   ;;  %s488_s1 = inlined_call_operand.hbm [shape: f32[4,4], index: 1, kind: input, shape index: {}]   ;;  %s489_s2 = inlined_call_operand.vmem [shape: f32[1,4], index: 2, kind: input, shape index: {}]   ;;  %s490_s3 = inlined_call_operand.vmem [shape: f32[4,4], index: 3, kind: input, shape index: {}]   ;;  %s491_s4 = inlined_call_operand.vmem [shape: f32[1,4], index: 4, kind: input, shape index: {}]   ;;  %s492_s5 = inlined_call_operand.hbm [shape: f32[2,1,4], index: 5, kind: output, shape index: {}]  }
   0x1   :  { %11 = vsyncpa [#allocation7], 0 }
   0x2   :  { %12 = vsyncpa [#allocation5], 0  ;;  %s423_s18 = smov [#allocation3]  }
   0x3   :  { %s18_s19 = sshll.u32 %s423_s18, 4  ;;  %s19_s19 = int_to_ptr.vmem [resolvable:$true] %s18_s19 }
   0x4   :  { %s365_s20 = scalar_lea.vmem %s19_s19, 256  ;;  %p370_p1 = scmp.lt.s32.totalorder %s19_s19, %s19_s19 }
   0x5   :  { %p366_p0 = scmp.ne.s32.totalorder %s19_s19, %s365_s20  ;;  %p371_p2 = scmp.lt.s32.totalorder %s365_s20, %s365_s20 }
   0x7   :  { %p372_p3 = por %p371_p2, %p370_p1 }
   0x9   :  { %p373_p4 = pnand %p372_p3, %p366_p0 }
   0xb   :  { %376 = shalt.err (!%p373_p4)
}
   0xc   :  { %s424_s21 = smov 128   ;;  %s425_s22 = smov 8  }
   0xd   :  { %24 = dma.hbm_to_vmem [thread:$0]  %s487_s0, 256, %s19_s19, [#allocation4], %s424_s21, %s424_s21, %s425_s22  }
   0xe   :  { %s426_s25 = smov [#allocation6]  }
   0xf   :  { %s31_s26 = sshll.u32 %s426_s25, 4  ;;  %s32_s26 = int_to_ptr.vmem [resolvable:$true] %s31_s26 }
  0x10   :  { %s385_s27 = scalar_lea.vmem %s32_s26, 64  ;;  %p390_p6 = scmp.lt.s32.totalorder %s32_s26, %s32_s26 }
  0x11   :  { %p386_p5 = scmp.ne.s32.totalorder %s32_s26, %s385_s27  ;;  %p391_p7 = scmp.lt.s32.totalorder %s385_s27, %s385_s27 }
  0x13   :  { %p392_p8 = por %p391_p7, %p390_p6 }
  0x15   :  { %p393_p9 = pnand %p392_p8, %p386_p5 }
  0x17   :  { %396 = shalt.err (!%p393_p9)
}
  0x18   :  { %34 = dma.hbm_to_vmem [thread:$0]  %s488_s1, 64, %s32_s26, [#allocation7]  }
  0x19   :  { %417 = dma.done.wait [#allocation4], 256  }
  0x1a   :  { %418 = vsyncadd [#allocation4], 4294967040 }
  0x1b   :  { %419 = dma.done.wait [#allocation7], 64  }
  0x1c   :  { %420 = vsyncadd [#allocation7], 4294967232  ;;  %vm72_vm0 = vcmask 1043456   ;;  %v53_v0 = vld [vmem:[#allocation3] sm:$0xff]  ;;  %v54_v1 = vld [vmem:[#allocation3 + $0x8] sm:$0xff]  ;;  %v427_v11 = vmov 0.0   ;;  %v95_v12 = vlaneseq }
  0x1d   :  { %v68_v2 = vcombine.high %v53_v0, %v53_v0  ;;  %v73_v3 = vsel %vm72_vm0, %v53_v0, 0.0  ;;  %v69_v4 = vcombine.high %v54_v1, %v54_v1  ;;  %v78_v6 = vsel %vm72_vm0, %v54_v1, 0.0  ;;  %v85_v10 = vld [vmem:[#allocation6] sm:$0xf]  ;;  %331 = vmatprep.subr.mxu0 %v427_v11  ;;  %336 = vmatprep.subr.mxu1 %v427_v11  ;;  %v184_v23 = vld [vmem:[%s490_s3] sm:$0xf] }
  0x1e   :  { %vm428_vm1 = vmmov 0   ;;  %332 = vmatpush3.msk.msra.mxu0 %vm72_vm0, %v85_v10  ;;  %v96_v13 = vand.u32 127, %v95_v12  ;;  %v98_v14 = vshrl.u32 %v95_v12, 7  ;;  %vm105_vm2 = vcmask 1041409   ;;  %337 = vmatpush3.msk.msra.mxu1 %vm72_vm0, %v184_v23  ;;  %v320_v24 = vld [vmem:[%s489_s2] ss:$0 sm:$0xff] }
  0x1f   :  { %v74_v5 = vsel %vm72_vm0, %v68_v2, 0.0  ;;  %v79_v7 = vsel %vm72_vm0, %v69_v4, 0.0  ;;  %333 = vmatprep.mubr.msk.f32.mxu0 %vm428_vm1, %v427_v11  ;;  %338 = vmatprep.mubr.msk.f32.mxu1 %vm428_vm1, %v427_v11  ;;  %vm107_vm3 = vcmask 31744   ;;  %v323_v29 = vld [vmem:[%s491_s4] ss:$0 sm:$0xff]  ;;  %s430_s2 = smov [#allocation8]  }
  0x20   :  { %v75_v8 = vadd.f32 %v74_v5, %v73_v3  ;;  %v80_v9 = vadd.f32 %v79_v7, %v78_v6  ;;  %v99_v16 = vsub.s32 %v96_v13, %v98_v14  ;;  %v429_v36 = vmov 1966171168   ;;  %s307_s3 = sshll.u32 %s430_s2, 4  ;;  %s308_s3 = int_to_ptr.vmem [resolvable:$true] %s307_s3 }
  0x21   :  { %v276_v37 = vunpack.c.l.s4 %v429_v36  ;;  %vm299_vm4 = vcmask 24576   ;;  %s397_s4 = scalar_lea.vmem %s308_s3, 32  ;;  %p402_p11 = scmp.lt.s32.totalorder %s308_s3, %s308_s3 }
  0x22   :  { %76 = vadd.xlane.f32.xlu0 %v75_v8  ;;  %p398_p10 = scmp.ne.s32.totalorder %s308_s3, %s397_s4  ;;  %p403_p12 = scmp.lt.s32.totalorder %s397_s4, %s397_s4 }
  0x23   :  { %v277_v38 = vunpack.c.0.s8 %v276_v37 }
  0x24   :  { %p404_p13 = por %p403_p12, %p402_p11 }
  0x25   :  { %v280_v39 = vsub.s32 %v277_v38, %v98_v14 }
  0x26   :  { %81 = vadd.xlane.f32.xlu0 %v80_v9  ;;  %p405_p0 = pnand %p404_p13, %p398_p10 }
  0xab   :  { %v77_v15 = vpop.xlane.xlu0 %76 }
  0xac   :  { %v83_v17 = vmul.f32 0.00390625, %v77_v15 }
  0xae   :  { %v100_v20 = vrot.slane %v83_v17, %v99_v16 }
  0xaf   :  { %v82_v18 = vpop.xlane.xlu0 %81 }
  0xb0   :  { %v84_v19 = vmul.f32 0.00390625, %v82_v18 }
  0xb2   :  { %v104_v21 = vrot.slane %v84_v19, %v99_v16 }
  0xb4   :  { %v106_v22 = vsel %vm105_vm2, %v104_v21, %v100_v20 }
  0xb5   :  { %334 = vmatmul.mubr.msk.f32.vlgmr.msra.gmra.mxu0 %vm107_vm3, %v106_v22 }
 0x175   :  { %v179_v25 = vpop.f32.mrf.mxu0 }
 0x176   :  { %v180_v26 = vadd.f32 %v320_v24, %v179_v25 }
 0x177   :  { %v335_v27 = vpop.f32.mrf.mxu0 }
 0x178   :  { %v183_v28 = vmax.f32 %v180_v26, 0.0 }
 0x17a   :  { %339 = vmatmul.mubr.msk.f32.vlgmr.msra.gmra.mxu1 %vm107_vm3, %v183_v28 }
 0x23a   :  { %v264_v30 = vpop.f32.mrf.mxu1 }
 0x23b   :  { %v265_v31 = vadd.f32 %v323_v29, %v264_v30 }
 0x23c   :  { %v340_v32 = vpop.f32.mrf.mxu1 }
 0x23d   :  { %v326_v33 = vmul.f32 -1.442695, %v265_v31 }
 0x23f   :  { %353 = vpow2.f32 %v326_v33 }
 0x24c   :  { %v354_v34 = vpop.eup %353 }
 0x24d   :  { %v271_v35 = vadd.f32 1.0, %v354_v34 }
 0x24f   :  { %355 = vrcp.f32 %v271_v35 }
 0x25c   :  { %v356_v40 = vpop.eup %355 }
 0x25d   :  { %v281_v41 = vrot.slane %v356_v40, %v280_v39 }
 0x25f   :  { %v282_v42 = vcombine.high %v281_v41, %v281_v41  ;;  %v289_v43 = vrot.slane %v281_v41, %v280_v39 }
 0x261   :  { %v296_v44 = vrot.slane %v282_v42, %v280_v39  ;;  %300 = vst.msk [vmem:[#allocation8] sm:$0x1] %vm299_vm4, %v289_v43 }
 0x263   :  { %301 = vst.msk [vmem:[#allocation8 + $0x1] sm:$0x1] %vm299_vm4, %v296_v44 }
 0x264   :  { %408 = shalt.err (!%p405_p0)
}
 0x265   :  { %s431_s9 = smov 16   ;;  %s432_s10 = smov 1  }
 0x266   :  { %313 = dma.vmem_to_hbm [thread:$0]  %s308_s3, 32, %s492_s5, [#allocation5], %s431_s9, %s431_s9, %s432_s10  }
 0x267   :  { %421 = dma.done.wait [#allocation5], 32  }
 0x268   :  { %422 = vsyncadd [#allocation5], 4294967264 }
 0x269   :  { %317 = vsyncpa [#allocation4], 1 }
 0x26a   :  { %318 = vsyncpa [#allocation7], 1 }
 0x26b   :  { %319 = vsyncpa [#allocation5], 1 }

</bundles_post_ra>
